<compile_context>
chip_gen: v7x
topology: tpu7x:2x2x1
jax: 0.10.0
libtpu: 0.0.40
codegen_flags: <defaults>
</compile_context>

<pallas_src>
import jax
import jax.numpy as jnp
from jax import lax
from jax.experimental import pallas as pl
from jax.experimental.pallas import tpu as pltpu

_LANES = 128
_SUBLANES = 8
_MAX_TILE_ROWS = 512   # 512x128 f32 = 256 KiB per input tile (sweep point from review)


def _round_up(v, m):
    return (v + m - 1) // m * m


def _moments_kernel(x_ref, y_ref, acc_ref):
    """Accumulate per-(sublane,lane) partial moments for one (tile_r, 128) tile.

    acc_ref: (1, 5, 8, 128) f32 output block, resident across grid axis 1
             (the reduction axis).  Slots: [Sx, Sy, Sxx, Syy, Sxy].
    """
    @pl.when(pl.program_id(1) == 0)
    def _():
        acc_ref[...] = jnp.zeros_like(acc_ref)

    x = x_ref[...].astype(jnp.float32)   # upcast in-kernel; bf16 stays bf16 over HBM
    y = y_ref[...].astype(jnp.float32)
    r8 = x.shape[0] // _SUBLANES
    xr = x.reshape(r8, _SUBLANES, _LANES)
    yr = y.reshape(r8, _SUBLANES, _LANES)

    # Leading-axis sums are pure VPU vreg adds (no XLU); the single cross-lane
    # reduction to scalars is paid exactly once, in the tiny epilogue.
    acc_ref[0, 0] += jnp.sum(xr, axis=0)
    acc_ref[0, 1] += jnp.sum(yr, axis=0)
    acc_ref[0, 2] += jnp.sum(xr * xr, axis=0)
    acc_ref[0, 3] += jnp.sum(yr * yr, axis=0)
    acc_ref[0, 4] += jnp.sum(xr * yr, axis=0)


@jax.jit
def pearson_correlation_loss(predictions, targets):
    """1 - Pearson correlation between the flattened inputs (matches the torch module)."""
    x = predictions.reshape(-1)
    y = targets.reshape(-1)
    n = x.shape[0]

    rows = -(-n // _LANES)
    # Up to 2 chunks on the leading "parallel" grid axis (dual-TC split on v7x;
    # negligible cost elsewhere).
    num_chunks = 2 if rows > _SUBLANES else 1
    rows_per_chunk = -(-rows // num_chunks)
    tile_r = min(_MAX_TILE_ROWS, _round_up(rows_per_chunk, _SUBLANES))
    rows_per_chunk = _round_up(rows_per_chunk, tile_r)
    steps = rows_per_chunk // tile_r
    total_rows = num_chunks * rows_per_chunk
    padded_n = total_rows * _LANES

    # Zero-padding is exact for the one-pass moment sums; the true n is used below.
    if padded_n != n:
        pad = padded_n - n
        x = jnp.pad(x, (0, pad))
        y = jnp.pad(y, (0, pad))
    x2 = x.reshape(total_rows, _LANES)   # lane-dense slab, native dtype
    y2 = y.reshape(total_rows, _LANES)

    moments = pl.pallas_call(
        _moments_kernel,
        out_shape=jax.ShapeDtypeStruct(
            (num_chunks, 5, _SUBLANES, _LANES), jnp.float32),
        grid_spec=pltpu.PrefetchScalarGridSpec(
            num_scalar_prefetch=0,
            grid=(num_chunks, steps),
            in_specs=[
                pl.BlockSpec((tile_r, _LANES), lambda c, k: (c * steps + k, 0)),
                pl.BlockSpec((tile_r, _LANES), lambda c, k: (c * steps + k, 0)),
            ],
            out_specs=pl.BlockSpec(
                (1, 5, _SUBLANES, _LANES), lambda c, k: (c, 0, 0, 0)),
        ),
        compiler_params=pltpu.CompilerParams(
            dimension_semantics=("parallel", "arbitrary")),
    )(x2, y2)

    # Tiny scalar epilogue: one cross-lane reduce of the per-lane partials plus
    # the closed-form one-pass Pearson combine (rsqrt instead of 2x sqrt + div).
    sums = jnp.sum(moments, axis=(0, 2, 3))               # (5,)
    sx, sy, sxx, syy, sxy = sums[0], sums[1], sums[2], sums[3], sums[4]
    n_f = jnp.float32(n)
    num = n_f * sxy - sx * sy
    # Note: like the torch reference, no eps guard for constant inputs (den == 0 -> nan/inf).
    den2 = (n_f * sxx - sx * sx) * (n_f * syy - sy * sy)
    cost = num * lax.rsqrt(den2)
    return 1.0 - cost


if __name__ == "__main__":
    key = jax.random.PRNGKey(0)
    k1, k2 = jax.random.split(key)
    # Small shapes consistent with a generic NCHW prediction/target pair.
    preds = jax.random.normal(k1, (2, 4, 16, 16), dtype=jnp.float32)
    targs = jax.random.normal(k2, (2, 4, 16, 16), dtype=jnp.float32) + 0.5 * preds

    loss = pearson_correlation_loss(preds, targs)
    jax.block_until_ready(loss)

    # Pure-JAX reference check (same two-pass math as the torch module).
    xf = preds.reshape(-1)
    yf = targs.reshape(-1)
    vx = xf - jnp.mean(xf)
    vy = yf - jnp.mean(yf)
    ref = 1.0 - jnp.sum(vx * vy) / (
        jnp.sqrt(jnp.sum(vx ** 2)) * jnp.sqrt(jnp.sum(vy ** 2))
    )
    assert jnp.allclose(loss, ref, atol=1e-5, rtol=1e-5), (loss, ref)

    print("KERNEL_OK")
</pallas_src>

<mosaic_0001>
module attributes {stable_mosaic.version = 11 : i64} {
  func.func @_moments_kernel(%arg0: i32, %arg1: i32, %arg2: memref<8x128xf32, #tpu.memory_space<vmem>>, %arg3: memref<8x128xf32, #tpu.memory_space<vmem>>, %arg4: memref<1x5x8x128xf32, #tpu.memory_space<vmem>>) attributes {dimension_semantics = [#tpu.dimension_semantics<parallel>, #tpu.dimension_semantics<arbitrary>], iteration_bounds = array<i64: 2, 1>, scalar_prefetch = 0 : i64, scratch_operands = 0 : i64, tpu.core_type = #tpu.core_type<tc>, window_params = [{transform_indices = @transform_0, window_bounds = array<i64: 8, 128>}, {transform_indices = @transform_1, window_bounds = array<i64: 8, 128>}, {transform_indices = @transform_2, window_bounds = array<i64: 1, 5, 8, 128>}]} {
    %c0_i32 = arith.constant 0 : i32
    %0 = arith.cmpi eq, %arg1, %c0_i32 : i32
    %1 = arith.extui %0 : i1 to i32
    %c0_i32_0 = arith.constant 0 : i32
    %2 = arith.cmpi ne, %1, %c0_i32_0 : i32
    scf.if %2 {
      %cst_44 = arith.constant 0.000000e+00 : f32
      %45 = vector.broadcast %cst_44 : f32 to vector<1x5x8x128xf32>
      %c0_45 = arith.constant 0 : index
      %c0_46 = arith.constant 0 : index
      %c0_47 = arith.constant 0 : index
      %c0_48 = arith.constant 0 : index
      %46 = vector.load %arg4[%c0_45, %c0_46, %c0_47, %c0_48] : memref<1x5x8x128xf32, #tpu.memory_space<vmem>>, vector<1x5x8x128xf32>
      tpu.vector_store %arg4[%c0_45, %c0_46, %c0_47, %c0_48], %45 {strides = array<i32>} : memref<1x5x8x128xf32, #tpu.memory_space<vmem>>, vector<1x5x8x128xf32>,
    } else {
    }
    %c0 = arith.constant 0 : index
    %c0_1 = arith.constant 0 : index
    %3 = vector.load %arg2[%c0, %c0_1] : memref<8x128xf32, #tpu.memory_space<vmem>>, vector<8x128xf32>
    %c0_2 = arith.constant 0 : index
    %c0_3 = arith.constant 0 : index
    %4 = vector.load %arg3[%c0_2, %c0_3] : memref<8x128xf32, #tpu.memory_space<vmem>>, vector<8x128xf32>
    %5 = vector.shape_cast %3 : vector<8x128xf32> to vector<1x8x128xf32>
    %6 = vector.shape_cast %4 : vector<8x128xf32> to vector<1x8x128xf32>
    %c0_4 = arith.constant 0 : index
    %c0_5 = arith.constant 0 : index
    %c0_6 = arith.constant 0 : index
    %c0_7 = arith.constant 0 : index
    %7 = vector.load %arg4[%c0_4, %c0_5, %c0_6, %c0_7] : memref<1x5x8x128xf32, #tpu.memory_space<vmem>>, vector<1x1x8x128xf32>
    %8 = vector.shape_cast %7 : vector<1x1x8x128xf32> to vector<8x128xf32>
    %cst = arith.constant dense<0.000000e+00> : vector<8x128xf32>
    %9 = vector.multi_reduction <add>, %5, %cst [0] : vector<1x8x128xf32> to vector<8x128xf32>
    %10 = arith.addf %8, %9 : vector<8x128xf32>
    %c0_8 = arith.constant 0 : index
    %c0_9 = arith.constant 0 : index
    %c0_10 = arith.constant 0 : index
    %c0_11 = arith.constant 0 : index
    %11 = vector.load %arg4[%c0_8, %c0_9, %c0_10, %c0_11] : memref<1x5x8x128xf32, #tpu.memory_space<vmem>>, vector<1x1x8x128xf32>
    %12 = vector.shape_cast %11 : vector<1x1x8x128xf32> to vector<8x128xf32>
    %13 = vector.shape_cast %10 : vector<8x128xf32> to vector<1x1x8x128xf32>
    tpu.vector_store %arg4[%c0_8, %c0_9, %c0_10, %c0_11], %13 {strides = array<i32>} : memref<1x5x8x128xf32, #tpu.memory_space<vmem>>, vector<1x1x8x128xf32>,
    %c0_12 = arith.constant 0 : index
    %c1 = arith.constant 1 : index
    %c0_13 = arith.constant 0 : index
    %c0_14 = arith.constant 0 : index
    %14 = vector.load %arg4[%c0_12, %c1, %c0_13, %c0_14] : memref<1x5x8x128xf32, #tpu.memory_space<vmem>>, vector<1x1x8x128xf32>
    %15 = vector.shape_cast %14 : vector<1x1x8x128xf32> to vector<8x128xf32>
    %cst_15 = arith.constant dense<0.000000e+00> : vector<8x128xf32>
    %16 = vector.multi_reduction <add>, %6, %cst_15 [0] : vector<1x8x128xf32> to vector<8x128xf32>
    %17 = arith.addf %15, %16 : vector<8x128xf32>
    %c0_16 = arith.constant 0 : index
    %c1_17 = arith.constant 1 : index
    %c0_18 = arith.constant 0 : index
    %c0_19 = arith.constant 0 : index
    %18 = vector.load %arg4[%c0_16, %c1_17, %c0_18, %c0_19] : memref<1x5x8x128xf32, #tpu.memory_space<vmem>>, vector<1x1x8x128xf32>
    %19 = vector.shape_cast %18 : vector<1x1x8x128xf32> to vector<8x128xf32>
    %20 = vector.shape_cast %17 : vector<8x128xf32> to vector<1x1x8x128xf32>
    tpu.vector_store %arg4[%c0_16, %c1_17, %c0_18, %c0_19], %20 {strides = array<i32>} : memref<1x5x8x128xf32, #tpu.memory_space<vmem>>, vector<1x1x8x128xf32>,
    %c0_20 = arith.constant 0 : index
    %c2 = arith.constant 2 : index
    %c0_21 = arith.constant 0 : index
    %c0_22 = arith.constant 0 : index
    %21 = vector.load %arg4[%c0_20, %c2, %c0_21, %c0_22] : memref<1x5x8x128xf32, #tpu.memory_space<vmem>>, vector<1x1x8x128xf32>
    %22 = vector.shape_cast %21 : vector<1x1x8x128xf32> to vector<8x128xf32>
    %23 = arith.mulf %5, %5 : vector<1x8x128xf32>
    %cst_23 = arith.constant dense<0.000000e+00> : vector<8x128xf32>
    %24 = vector.multi_reduction <add>, %23, %cst_23 [0] : vector<1x8x128xf32> to vector<8x128xf32>
    %25 = arith.addf %22, %24 : vector<8x128xf32>
    %c0_24 = arith.constant 0 : index
    %c2_25 = arith.constant 2 : index
    %c0_26 = arith.constant 0 : index
    %c0_27 = arith.constant 0 : index
    %26 = vector.load %arg4[%c0_24, %c2_25, %c0_26, %c0_27] : memref<1x5x8x128xf32, #tpu.memory_space<vmem>>, vector<1x1x8x128xf32>
    %27 = vector.shape_cast %26 : vector<1x1x8x128xf32> to vector<8x128xf32>
    %28 = vector.shape_cast %25 : vector<8x128xf32> to vector<1x1x8x128xf32>
    tpu.vector_store %arg4[%c0_24, %c2_25, %c0_26, %c0_27], %28 {strides = array<i32>} : memref<1x5x8x128xf32, #tpu.memory_space<vmem>>, vector<1x1x8x128xf32>,
    %c0_28 = arith.constant 0 : index
    %c3 = arith.constant 3 : index
    %c0_29 = arith.constant 0 : index
    %c0_30 = arith.constant 0 : index
    %29 = vector.load %arg4[%c0_28, %c3, %c0_29, %c0_30] : memref<1x5x8x128xf32, #tpu.memory_space<vmem>>, vector<1x1x8x128xf32>
    %30 = vector.shape_cast %29 : vector<1x1x8x128xf32> to vector<8x128xf32>
    %31 = arith.mulf %6, %6 : vector<1x8x128xf32>
    %cst_31 = arith.constant dense<0.000000e+00> : vector<8x128xf32>
    %32 = vector.multi_reduction <add>, %31, %cst_31 [0] : vector<1x8x128xf32> to vector<8x128xf32>
    %33 = arith.addf %30, %32 : vector<8x128xf32>
    %c0_32 = arith.constant 0 : index
    %c3_33 = arith.constant 3 : index
    %c0_34 = arith.constant 0 : index
    %c0_35 = arith.constant 0 : index
    %34 = vector.load %arg4[%c0_32, %c3_33, %c0_34, %c0_35] : memref<1x5x8x128xf32, #tpu.memory_space<vmem>>, vector<1x1x8x128xf32>
    %35 = vector.shape_cast %34 : vector<1x1x8x128xf32> to vector<8x128xf32>
    %36 = vector.shape_cast %33 : vector<8x128xf32> to vector<1x1x8x128xf32>
    tpu.vector_store %arg4[%c0_32, %c3_33, %c0_34, %c0_35], %36 {strides = array<i32>} : memref<1x5x8x128xf32, #tpu.memory_space<vmem>>, vector<1x1x8x128xf32>,
    %c0_36 = arith.constant 0 : index
    %c4 = arith.constant 4 : index
    %c0_37 = arith.constant 0 : index
    %c0_38 = arith.constant 0 : index
    %37 = vector.load %arg4[%c0_36, %c4, %c0_37, %c0_38] : memref<1x5x8x128xf32, #tpu.memory_space<vmem>>, vector<1x1x8x128xf32>
    %38 = vector.shape_cast %37 : vector<1x1x8x128xf32> to vector<8x128xf32>
    %39 = arith.mulf %5, %6 : vector<1x8x128xf32>
    %cst_39 = arith.constant dense<0.000000e+00> : vector<8x128xf32>
    %40 = vector.multi_reduction <add>, %39, %cst_39 [0] : vector<1x8x128xf32> to vector<8x128xf32>
    %41 = arith.addf %38, %40 : vector<8x128xf32>
    %c0_40 = arith.constant 0 : index
    %c4_41 = arith.constant 4 : index
    %c0_42 = arith.constant 0 : index
    %c0_43 = arith.constant 0 : index
    %42 = vector.load %arg4[%c0_40, %c4_41, %c0_42, %c0_43] : memref<1x5x8x128xf32, #tpu.memory_space<vmem>>, vector<1x1x8x128xf32>
    %43 = vector.shape_cast %42 : vector<1x1x8x128xf32> to vector<8x128xf32>
    %44 = vector.shape_cast %41 : vector<8x128xf32> to vector<1x1x8x128xf32>
    tpu.vector_store %arg4[%c0_40, %c4_41, %c0_42, %c0_43], %44 {strides = array<i32>} : memref<1x5x8x128xf32, #tpu.memory_space<vmem>>, vector<1x1x8x128xf32>,
    return
  }
  func.func @transform_0(%arg0: i32, %arg1: i32) -> (i32, i32) {
    %c1_i32 = arith.constant 1 : i32
    %0 = arith.muli %arg0, %c1_i32 : i32
    %1 = arith.addi %0, %arg1 : i32
    %c0_i32 = arith.constant 0 : i32
    %c0_i32_0 = arith.constant 0 : i32
    return %1, %c0_i32 : i32, i32
  }
  func.func @transform_1(%arg0: i32, %arg1: i32) -> (i32, i32) {
    %c1_i32 = arith.constant 1 : i32
    %0 = arith.muli %arg0, %c1_i32 : i32
    %1 = arith.addi %0, %arg1 : i32
    %c0_i32 = arith.constant 0 : i32
    %c0_i32_0 = arith.constant 0 : i32
    return %1, %c0_i32 : i32, i32
  }
  func.func @transform_2(%arg0: i32, %arg1: i32) -> (i32, i32, i32, i32) {
    %c0_i32 = arith.constant 0 : i32
    %c0_i32_0 = arith.constant 0 : i32
    %c0_i32_1 = arith.constant 0 : i32
    %c0_i32_2 = arith.constant 0 : i32
    return %arg0, %c0_i32, %c0_i32_0, %c0_i32_1 : i32, i32, i32, i32
  }
}

</mosaic_0001>

<bundles_post_ra>
// kernel: pearson_correlation_loss.1
= control target key start
LH: loop header
LB: loop body
LE: loop exit
PB: predicated region body
PF: predicated region fallthrough
CT: control target
= control target key end

     0   :  { %s380_s9 = smov 0   ;;  %s382_s10 = smov 0   ;;  %s409_s0 = inlined_call_operand.vmem [shape: f32[16,128], index: 0, kind: input, shape index: {}]   ;;  %s410_s1 = inlined_call_operand.vmem [shape: f32[16,128], index: 1, kind: input, shape index: {}]   ;;  %s411_s2 = inlined_call_operand.vmem [shape: f32[2,5,8,128], index: 2, kind: output, shape index: {}]  }
   0x1   :  { %s384_s11 = smov 0  }
   0x2 LB: > { %s24_s12 = sadd.s32 1, %s359_s10  ;;  %p301_p0 = scmp.ge.s32.totalorder %s363_s11, 1  ;;  %s363_s11 = sphi %s384_s11, %s12_s11   ;;  %s359_s10 = sphi %s382_s10, %s413_s10   ;;  %s355_s9 = sphi %s380_s9, %s412_s9  }
   0x3   : > { %p26_p1 = scmp.ge.s32.totalorder %s24_s12, 2  ;;  %p140_p2 = scmp.lt.s32.totalorder %s363_s11, 3 }
   0x5   : > { %s415_s12 = smov (%p26_p1, %s24_s12), 0  ;;  %p141_p3 = pnand %p301_p0, %p140_p2 }
   0x6   : > { %p168_p4 = scmp.lt.s32.totalorder (!%p141_p3), %s355_s9, 1 }
   0x7   : > { %144 = sbr.rel (%p141_p3) target bundleno = 22 (0x16), region = 28 }
   0xe   : > { %s417_s9 = smov (!%p168_p4, %s355_s9), 1 }
   0xf   : > { %s315_s13 = smul.u32 40, %s417_s9  ;;  %s302_s14 = sshll.u32 %s417_s9, 3 }
  0x10   : > { %s171_s17 = scalar_lea.vmem %s409_s0, %s302_s14  ;;  %s177_s20 = scalar_lea.vmem %s410_s1, %s302_s14 }
  0x11   : > { %s183_s23 = scalar_lea.vmem %s411_s2, %s315_s13  ;;  %v193_v0 = vld [vmem:[%s171_s17] sm:$0xff] }
  0x12   : > { %v194_v1 = vld [vmem:[%s177_s20] sm:$0xff]  ;;  %v206_v2 = vmul.f32 %v193_v0, %v193_v0  ;;  %198 = vst [vmem:[%s183_s23] sm:$0xff] %v193_v0 }
  0x13   : > { %v212_v3 = vmul.f32 %v194_v1, %v194_v1  ;;  %v218_v4 = vmul.f32 %v194_v1, %v193_v0  ;;  %306 = vst [vmem:[%s183_s23 + $0x8] sm:$0xff] %v194_v1 }
  0x14   : > { %308 = vst [vmem:[%s183_s23 + $0x10] sm:$0xff] %v206_v2 }
  0x15   : > { %310 = vst [vmem:[%s183_s23 + $0x18] sm:$0xff] %v212_v3  ;;  %312 = vst [vmem:[%s183_s23 + $0x20] sm:$0xff] %v218_v4 }
  0x16 PF: > { %s12_s11 = sadd.s32 1, %s363_s11   ;;  %s412_s9 = smov %s359_s10 }
  0x17   : > { %p9_p5 = scmp.ge.s32.totalorder %s12_s11, 4   ;;  %s413_s10 = smov %s415_s12 }
  0x19   :  { %11 = sbr.rel (!%p9_p5) target bundleno = 2 (0x2), region = 69 }

</bundles_post_ra>
